<compile_context>
chip_gen: v7x
topology: tpu7x:2x2x1
jax: 0.10.0
libtpu: 0.0.40
codegen_flags: <defaults>
</compile_context>

<pallas_src>
import jax
import jax.numpy as jnp
from jax.experimental import pallas as pl
from jax.experimental.pallas import tpu as pltpu


# ----------------------------- helpers -------------------------------------


def _round_up(x, m):
    return ((x + m - 1) // m) * m


def _sublane_min(dtype):
    # minimum second-to-last block dim for dense packed layout:
    # 8 for 4-byte, 16 for 2-byte, 32 for 1-byte dtypes.
    return max(8, 32 // jnp.dtype(dtype).itemsize)


def _pick_tm(M, sublane):
    # Prefer a tile that divides M exactly (no M padding / output slice).
    for cand in (512, 256, 128, 64, 32, 16, 8):
        if cand % sublane == 0 and M % cand == 0:
            return cand
    if M <= 512:
        return _round_up(M, sublane)
    # TODO(synk): handle the ragged last M block with a masked store instead of
    # the pad + slice fallback below.
    return 256


def _pick_tn(Np, want_multiple_tiles):
    cands = (512, 256, 128)
    if want_multiple_tiles:
        # small-M case: make sure the j axis has >= 2 tiles so both v7x
        # TensorCores (and megacore sharding in general) get work.
        for c in cands:
            if Np % c == 0 and Np // c >= 2:
                return c
    for c in cands:
        if Np % c == 0:
            return c
    return 128


def _pick_tk(Kp, itemsize):
    # Prefer contracting all of K in one step (x row-band never re-fetched
    # across the j sweep, no k loop) whenever the tile stays VMEM-bounded:
    # K <= 2048 for f32, K <= 4096 for bf16.
    if Kp * itemsize <= 8192:
        return Kp
    best = 128
    for c in range(128, min(Kp, 2048) + 1, 128):
        if Kp % c == 0:
            best = c
    return best


# ----------------------------- kernels --------------------------------------
# All kernels consume the weight pre-transposed to (K, N) layout so the MXU
# contraction is the canonical (tm,tk) x (tk,tn) one.


def _single_k_bias_kernel(x_ref, w_ref, b_ref, o_ref):
    acc = jnp.dot(x_ref[...], w_ref[...], preferred_element_type=jnp.float32)
    acc = acc + b_ref[...].astype(jnp.float32)
    o_ref[...] = acc.astype(o_ref.dtype)


def _single_k_nobias_kernel(x_ref, w_ref, o_ref):
    o_ref[...] = jnp.dot(
        x_ref[...], w_ref[...], preferred_element_type=jnp.float32
    ).astype(o_ref.dtype)


def _multi_k_inplace_bias_kernel(x_ref, w_ref, b_ref, o_ref):
    # o_ref is f32 and resident across the k axis (its index_map ignores k),
    # so it doubles as the accumulator: no VMEM scratch, no epilogue copy.
    @pl.when(pl.program_id(2) == 0)
    def _():
        o_ref[...] = jnp.broadcast_to(
            b_ref[...].astype(jnp.float32), o_ref.shape
        )

    o_ref[...] += jnp.dot(
        x_ref[...], w_ref[...], preferred_element_type=jnp.float32
    )


def _multi_k_inplace_nobias_kernel(x_ref, w_ref, o_ref):
    @pl.when(pl.program_id(2) == 0)
    def _():
        o_ref[...] = jnp.zeros_like(o_ref)

    o_ref[...] += jnp.dot(
        x_ref[...], w_ref[...], preferred_element_type=jnp.float32
    )


def _multi_k_scratch_bias_kernel(x_ref, w_ref, b_ref, o_ref, acc_ref):
    @pl.when(pl.program_id(2) == 0)
    def _():
        acc_ref[...] = jnp.broadcast_to(
            b_ref[...].astype(jnp.float32), acc_ref.shape
        )

    acc_ref[...] += jnp.dot(
        x_ref[...], w_ref[...], preferred_element_type=jnp.float32
    )

    @pl.when(pl.program_id(2) == pl.num_programs(2) - 1)
    def _():
        o_ref[...] = acc_ref[...].astype(o_ref.dtype)


def _multi_k_scratch_nobias_kernel(x_ref, w_ref, o_ref, acc_ref):
    @pl.when(pl.program_id(2) == 0)
    def _():
        acc_ref[...] = jnp.zeros_like(acc_ref)

    acc_ref[...] += jnp.dot(
        x_ref[...], w_ref[...], preferred_element_type=jnp.float32
    )

    @pl.when(pl.program_id(2) == pl.num_programs(2) - 1)
    def _():
        o_ref[...] = acc_ref[...].astype(o_ref.dtype)


# ----------------------------- module wrapper -------------------------------


class PallasLinear:
    """TPU analogue of intel_npu_acceleration_library.nn.Linear (eval mode).

    weight: (outC, inC), bias: (outC,) or None.
    The weight transpose to (K, N) and the K/N padding happen ONCE here
    (static inference parameters), never in the per-call hot path.
    """

    def __init__(self, weight, bias=None, *, tk=None):
        self.outC, self.inC = weight.shape
        self.w_dtype = weight.dtype

        K, N = self.inC, self.outC
        self.Kp = _round_up(K, 128)
        self.Np = _round_up(N, 128)

        if tk is None:
            tk = _pick_tk(self.Kp, jnp.dtype(self.w_dtype).itemsize)
        assert tk % 128 == 0 and self.Kp % tk == 0, "tk must be a 128-multiple divisor of padded K"
        self.tk = tk

        # One-time transpose + pad of the static parameter (K, N) layout.
        wT = jnp.transpose(weight)  # (K, N)
        if (self.Kp, self.Np) != (K, N):
            wT = jnp.pad(wT, ((0, self.Kp - K), (0, self.Np - N)))
        self.wT = wT

        if bias is not None:
            b2d = bias.reshape(1, N)
            if self.Np != N:
                b2d = jnp.pad(b2d, ((0, 0), (0, self.Np - N)))
            self.bias = b2d
        else:
            self.bias = None

        # TODO(synk): QuantizedLinear ((u)int8 weight + scale dequant matmul)
        # is not implemented here; only the float Linear forward is covered.

    def __call__(self, x):
        orig_lead = x.shape[:-1]
        x2d = x.reshape(-1, self.inC)
        M, K = x2d.shape
        N, Kp, Np, tk = self.outC, self.Kp, self.Np, self.tk
        x_dtype = x2d.dtype
        out_dtype = x_dtype

        # ---- tile selection -------------------------------------------------
        sublane = _sublane_min(x_dtype)
        tm = _pick_tm(M, sublane)
        Mp = _round_up(M, tm)
        single_m = Mp == tm
        tn = _pick_tn(Np, single_m)

        # ---- pad x only when unavoidable (ragged M or non-128 K) -----------
        pad_m, pad_k = Mp - M, Kp - K
        if pad_m or pad_k:
            x2d = jnp.pad(x2d, ((0, pad_m), (0, pad_k)))

        grid_m, grid_n, grid_k = Mp // tm, Np // tn, Kp // tk
        single_k = grid_k == 1
        has_bias = self.bias is not None

        # ---- cost estimate (accounts for re-streaming) ----------------------
        x_bytes = Mp * Kp * jnp.dtype(x_dtype).itemsize
        w_bytes = Kp * Np * jnp.dtype(self.w_dtype).itemsize
        o_bytes = Mp * Np * jnp.dtype(out_dtype).itemsize
        b_bytes = (Np * jnp.dtype(self.bias.dtype).itemsize) if has_bias else 0
        cost = pl.CostEstimate(
            flops=2 * Mp * Np * Kp,
            transcendentals=0,
            bytes_accessed=(
                x_bytes * grid_n + w_bytes * grid_m + o_bytes + b_bytes * grid_m
            ),
        )

        if single_k:
            # ---- specialized single-K-step path: no scratch, no pl.when -----
            grid = (grid_m, grid_n)
            in_specs = [
                pl.BlockSpec((tm, Kp), lambda i, j: (i, 0)),
                pl.BlockSpec((Kp, tn), lambda i, j: (0, j)),
            ]
            if has_bias:
                in_specs.append(pl.BlockSpec((1, tn), lambda i, j: (0, j)))
            out_spec = pl.BlockSpec((tm, tn), lambda i, j: (i, j))
            kernel = _single_k_bias_kernel if has_bias else _single_k_nobias_kernel
            scratch_shapes = []
            semantics = ("parallel", "parallel")
            out_shape = jax.ShapeDtypeStruct((Mp, Np), out_dtype)
        else:
            grid = (grid_m, grid_n, grid_k)
            in_specs = [
                pl.BlockSpec((tm, tk), lambda i, j, k: (i, k)),
                pl.BlockSpec((tk, tn), lambda i, j, k: (k, j)),
            ]
            if has_bias:
                in_specs.append(pl.BlockSpec((1, tn), lambda i, j, k: (0, j)))
            out_spec = pl.BlockSpec((tm, tn), lambda i, j, k: (i, j))
            semantics = ("parallel", "parallel", "arbitrary")
            if out_dtype == jnp.float32:
                # f32 output: accumulate directly into o_ref (resident across k).
                kernel = (
                    _multi_k_inplace_bias_kernel
                    if has_bias
                    else _multi_k_inplace_nobias_kernel
                )
                scratch_shapes = []
            else:
                kernel = (
                    _multi_k_scratch_bias_kernel
                    if has_bias
                    else _multi_k_scratch_nobias_kernel
                )
                scratch_shapes = [pltpu.VMEM((tm, tn), jnp.float32)]
            out_shape = jax.ShapeDtypeStruct((Mp, Np), out_dtype)

        call = pl.pallas_call(
            kernel,
            out_shape=out_shape,
            grid_spec=pltpu.PrefetchScalarGridSpec(
                num_scalar_prefetch=0,
                grid=grid,
                in_specs=in_specs,
                out_specs=out_spec,
                scratch_shapes=scratch_shapes,
            ),
            compiler_params=pltpu.CompilerParams(dimension_semantics=semantics),
            cost_estimate=cost,
        )

        if has_bias:
            out2d = call(x2d, self.wT, self.bias)
        else:
            out2d = call(x2d, self.wT)

        if (Mp, Np) != (M, N):
            out2d = out2d[:M, :N]
        return out2d.reshape(*orig_lead, N)


def linear_forward(x, weight, bias=None, *, tk=None):
    """Functional convenience wrapper (parameter prep is redone each call;
    prefer constructing PallasLinear once for repeated use)."""
    return PallasLinear(weight, bias, tk=tk)(x)


# ----------------------------- demo / checks --------------------------------

if __name__ == "__main__":
    key = jax.random.PRNGKey(0)
    kx, kw, kb = jax.random.split(key, 3)

    # Shapes consistent with the module: batch=2, seq=8, inC=128, outC=256
    batch, seq, inC, outC = 2, 8, 128, 256
    x = jax.random.normal(kx, (batch, seq, inC), dtype=jnp.float32)
    weight = jax.random.normal(kw, (outC, inC), dtype=jnp.float32) * 0.02
    bias = jax.random.normal(kb, (outC,), dtype=jnp.float32) * 0.1

    # f32, single-K-step specialized path, bias + no-bias.
    lin = PallasLinear(weight, bias)
    lin_nb = PallasLinear(weight, None)
    out = jax.block_until_ready(lin(x))
    out_nb = jax.block_until_ready(lin_nb(x))
    assert out.shape == (batch, seq, outC)
    assert jnp.allclose(out, x @ weight.T + bias, atol=1e-4, rtol=1e-4)
    assert jnp.allclose(out_nb, x @ weight.T, atol=1e-4, rtol=1e-4)

    # Multi-K-step path (force tk < K): f32 accumulates directly into o_ref.
    kx2, kw2 = jax.random.split(kx)
    x2 = jax.random.normal(kx2, (4, 256), dtype=jnp.float32)
    w2 = jax.random.normal(kw2, (256, 256), dtype=jnp.float32) * 0.02
    lin2 = PallasLinear(w2, bias, tk=128)
    out2 = jax.block_until_ready(lin2(x2))
    assert jnp.allclose(out2, x2 @ w2.T + bias, atol=1e-4, rtol=1e-4)

    # bf16 path: dtype-aware sublane tiling + multi-K f32 scratch accumulator.
    lin_bf = PallasLinear(
        w2.astype(jnp.bfloat16), bias.astype(jnp.bfloat16), tk=128
    )
    out_bf = jax.block_until_ready(lin_bf(x2.astype(jnp.bfloat16)))
    assert jnp.allclose(
        out_bf.astype(jnp.float32), x2 @ w2.T + bias, atol=1e-1, rtol=5e-2
    )

    # Non-tile-multiple (M, K, N) exercises the pad/slice fallback.
    x3 = jax.random.normal(kx, (1, 10, 100), dtype=jnp.float32)
    w3 = jax.random.normal(kw, (200, 100), dtype=jnp.float32) * 0.02
    b3 = jax.random.normal(kb, (200,), dtype=jnp.float32) * 0.1
    lin3 = PallasLinear(w3, b3)
    out3 = jax.block_until_ready(lin3(x3))
    assert out3.shape == (1, 10, 200)
    assert jnp.allclose(out3, x3 @ w3.T + b3, atol=1e-4, rtol=1e-4)

    print("KERNEL_OK")
</pallas_src>

<mosaic_0001>
module attributes {stable_mosaic.version = 11 : i64} {
  func.func @_single_k_bias_kernel(%arg0: i32, %arg1: i32, %arg2: memref<16x128xf32, #tpu.memory_space<vmem>>, %arg3: memref<128x128xf32, #tpu.memory_space<vmem>>, %arg4: memref<1x128xf32, #tpu.memory_space<vmem>>, %arg5: memref<16x128xf32, #tpu.memory_space<vmem>>) attributes {dimension_semantics = [#tpu.dimension_semantics<parallel>, #tpu.dimension_semantics<parallel>], iteration_bounds = array<i64: 1, 2>, scalar_prefetch = 0 : i64, scratch_operands = 0 : i64, tpu.core_type = #tpu.core_type<tc>, window_params = [{transform_indices = @transform_0, window_bounds = array<i64: 16, 128>}, {transform_indices = @transform_1, window_bounds = array<i64: 128, 128>}, {transform_indices = @transform_2, window_bounds = array<i64: 1, 128>}, {transform_indices = @transform_3, window_bounds = array<i64: 16, 128>}]} {
    %c0 = arith.constant 0 : index
    %c0_0 = arith.constant 0 : index
    %0 = vector.load %arg2[%c0, %c0_0] : memref<16x128xf32, #tpu.memory_space<vmem>>, vector<16x128xf32>
    %c0_1 = arith.constant 0 : index
    %c0_2 = arith.constant 0 : index
    %1 = vector.load %arg3[%c0_1, %c0_2] : memref<128x128xf32, #tpu.memory_space<vmem>>, vector<128x128xf32>
    %cst = arith.constant dense<0.000000e+00> : vector<16x128xf32>
    %2 = tpu.matmul %0, %1, %cst {dimension_numbers = #tpu.dot_dimension_numbers<[1], [0], [0], [1], [0, 0, 1, 1], [], []>} : vector<16x128xf32>, vector<128x128xf32>, vector<16x128xf32> -> vector<16x128xf32>
    %c0_3 = arith.constant 0 : index
    %c0_4 = arith.constant 0 : index
    %3 = vector.load %arg4[%c0_3, %c0_4] : memref<1x128xf32, #tpu.memory_space<vmem>>, vector<1x128xf32>
    %4 = vector.broadcast %3 : vector<1x128xf32> to vector<16x128xf32>
    %5 = arith.addf %2, %4 : vector<16x128xf32>
    %c0_5 = arith.constant 0 : index
    %c0_6 = arith.constant 0 : index
    %6 = vector.load %arg5[%c0_5, %c0_6] : memref<16x128xf32, #tpu.memory_space<vmem>>, vector<16x128xf32>
    tpu.vector_store %arg5[%c0_5, %c0_6], %5 {strides = array<i32>} : memref<16x128xf32, #tpu.memory_space<vmem>>, vector<16x128xf32>,
    return
  }
  func.func @transform_0(%arg0: i32, %arg1: i32) -> (i32, i32) {
    %c0_i32 = arith.constant 0 : i32
    %c0_i32_0 = arith.constant 0 : i32
    return %arg0, %c0_i32 : i32, i32
  }
  func.func @transform_1(%arg0: i32, %arg1: i32) -> (i32, i32) {
    %c0_i32 = arith.constant 0 : i32
    %c0_i32_0 = arith.constant 0 : i32
    return %c0_i32, %arg1 : i32, i32
  }
  func.func @transform_2(%arg0: i32, %arg1: i32) -> (i32, i32) {
    %c0_i32 = arith.constant 0 : i32
    %c0_i32_0 = arith.constant 0 : i32
    return %c0_i32, %arg1 : i32, i32
  }
  func.func @transform_3(%arg0: i32, %arg1: i32) -> (i32, i32) {
    %c0_i32 = arith.constant 0 : i32
    return %arg0, %arg1 : i32, i32
  }
}

</mosaic_0001>

<bundles_post_ra>
// kernel: tpu_custom_call.1
= control target key start
LH: loop header
LB: loop body
LE: loop exit
PB: predicated region body
PF: predicated region fallthrough
CT: control target
= control target key end

     0   :  { %8 = vsyncpa [#allocation3], 0  ;;  %s1069_s0 = inlined_call_operand.hbm [shape: f32[16,128], index: 0, kind: input, shape index: {}]   ;;  %s1070_s1 = inlined_call_operand.hbm [shape: f32[128,256], index: 1, kind: input, shape index: {}]   ;;  %s1071_s2 = inlined_call_operand.vmem [shape: f32[1,256], index: 2, kind: input, shape index: {}]   ;;  %s1072_s3 = inlined_call_operand.hbm [shape: f32[16,256], index: 3, kind: output, shape index: {}]  }
   0x1   :  { %9 = vsyncpa [#allocation6], 0 }
   0x2   :  { %11 = vsyncpa [#allocation6 + $0x1], 0 }
   0x3   :  { %12 = vsyncpa [#allocation4], 0 }
   0x4   :  { %14 = vsyncpa [#allocation4 + $0x1], 0  ;;  %s820_s12 = smov 0   ;;  %s822_s13 = smov 0  }
   0x5   :  { %s824_s14 = smov 0   ;;  %s826_s15 = smov 0  }
   0x6   :  { %s828_s16 = smov 0   ;;  %s830_s17 = smov 0  }
   0x7 LB: > { %s465_s18 = sadd.s32 4294967295, %s789_s17   ;;  %s466_s19 = sadd.s32 4294967294, %s789_s17   ;;  %s789_s17 = sphi %s830_s17, %s20_s17   ;;  %s785_s16 = sphi %s828_s16, %s1100_s16   ;;  %s781_s15 = sphi %s826_s15, %s1099_s15   ;;  %s777_s14 = sphi %s824_s14, %s1098_s14   ;;  %s773_s13 = sphi %s822_s13, %s1097_s13   ;;  %s769_s12 = sphi %s820_s12, %s1096_s12  }
   0x8   : > { %p72_p0 = scmp.ne.s32.totalorder %s777_s14, %s773_s13  ;;  %p73_p1 = scmp.eq.s32.totalorder %s789_s17, 0 }
   0x9   : > { %p78_p2 = scmp.ne.s32.totalorder %s773_s13, %s769_s12  ;;  %p857_p3 = scmp.eq.s32.totalorder %s465_s18, 0 }
   0xa   : > { %p861_p4 = por %p73_p1, %p72_p0  ;;  %p130_p5 = scmp.eq.s32.totalorder %s465_s18, 1 }
   0xb   : > { %s1080_s20 = scalar_select %p857_p3, 1, 0 }
   0xc   : > { %p867_p6 = por %p857_p3, %p78_p2  ;;  %p136_p7 = scmp.eq.s32.totalorder %s466_s19, 1 }
   0xd   : > { %p871_p8 = por %p130_p5, %p72_p0  ;;  %p467_p9 = scmp.ge.s32.totalorder %s789_s17, 1 }
   0xe   : > { %s1082_s22 = scalar_select %p867_p6, 1, 0 }
   0xf   : > { %s1083_s23 = scalar_select %p871_p8, 1, 0 }
  0x10   : > { %p876_p10 = por %p136_p7, %p78_p2  ;;  %p143_p11 = scmp.lt.s32.totalorder %s789_s17, 3 }
  0x11   : > { %s791_s26 = smov [#allocation2]   ;;  %p587_p1 = scmp.lt.s32.totalorder %s789_s17, 2 }
  0x12   : > { %s1084_s24 = scalar_select %p876_p10, 1, 0 }
  0x13   : > { %p881_p12 = pnand %p467_p9, %p143_p11  ;;  %s158_s27 = sshll.u32 %s791_s26, 4  ;;  %s885_s27 = int_to_ptr.vmem [resolvable:$true] %s158_s27 }
  0x14   : > { %p899_p2 = pnand %p587_p1, %p861_p4  ;;  %s29_s30 = sadd.s32 1, %s785_s16 }
  0x15   : > { %s1085_s25 = scalar_select %p881_p12, 1, 0 }
  0x16   : > { %p574_p13 = pneg %p881_p12  ;;  %s645_s6 = scalar_lea.hbm %s1069_s0, 256 }
  0x17   : > { %s1087_s29 = scalar_select %p899_p2, 1, 0 }
  0x18   : > { %p893_p5 = pnand %p574_p13, %p857_p3  ;;  %p646_p7 = scmp.ne.s32.totalorder %s1069_s0, %s645_s6 }
  0x19   : > { %p652_p4 = scmp.lt.u32.totalorder %s645_s6, %s1069_s0 }
  0x1a   : > { %p647_p9 = pneg %p893_p5 }
  0x1c   : > { %p648_p11 = pnand %p647_p9, %p646_p7 }
  0x1e   : > { %p649_p13 = pneg %p648_p11 }
  0x20   : > { %p654_p1 = pnand %p652_p4, %p649_p13 }
  0x22   : > { %657 = shalt.err (!%p654_p1)
}
  0x23   : > { %s658_s11 = scalar_lea.vmem %s885_s27, 256  ;;  %p666_p6 = scmp.lt.s32.totalorder %s885_s27, %s885_s27 }
  0x24   : > { %p659_p0 = scmp.ne.s32.totalorder %s885_s27, %s658_s11  ;;  %p667_p3 = scmp.lt.s32.totalorder %s658_s11, %s658_s11 }
  0x26   : > { %p661_p10 = pnand %p659_p0, %p647_p9  ;;  %p668_p12 = por %p667_p3, %p666_p6 }
  0x28   : > { %p662_p8 = pneg %p661_p10 }
  0x2a   : > { %p669_p2 = pnand %p668_p12, %p662_p8 }
  0x2c   : > { %672 = shalt.err (!%p669_p2)
}
  0x2d   : > { %s1079_s18 = smov 128   ;;  %s793_s19 = smov 8  }
  0x2e   : > { %577 = dma.hbm_to_vmem [thread:$0]  (!%p893_p5), %s1069_s0, 256, %s885_s27, [#allocation3], %s1079_s18, %s1079_s18, %s793_s19  }
  0x2f   : > { %p30_p3 = scmp.ge.s32.totalorder %s29_s30, 2  ;;  %s65_s4 = sadd.s32 1, %s777_s14 }
  0x30   : > { %s172_s5 = sand.u32 1, %s777_s14   ;;  %s471_s8 = sshll.u32 %s785_s16, 7 }
  0x31   : > { %s1102_s30 = smov (%p30_p3, %s29_s30), 0  ;;  %s470_s6 = sshll.u32 %s172_s5, 7 }
  0x32   : > { %s62_s7 = ssub.s32 %s785_s16, %s1102_s30  ;;  %s938_s10 = scalar_lea.hbm %s1070_s1, %s471_s8 }
  0x33   : > { %p63_p6 = scmp.eq.s32.totalorder %s62_s7, 0  ;;  %s176_s27 = scalar_lea.vmem [#allocation5], %s470_s6 }
  0x34   : > { %s182_s11 = sshll.u32 %s176_s27, 4  ;;  %s945_s26 = scalar_lea.sflag [#allocation6], %s172_s5  ;;  %s943_s11 = int_to_ptr.vmem [resolvable:$true] %s182_s11 }
  0x35   : > { %s941_s21 = scalar_select %p63_p6, %s777_s14, %s65_s4  }
  0x36   : > { %s673_s18 = scalar_lea.hbm %s938_s10, 2048  ;;  %p1088_p10 = scmp.ne.s32.totalorder %s1087_s29, 0 }
  0x37   : > { %p674_p8 = scmp.ne.s32.totalorder %s938_s10, %s673_s18  ;;  %s678_s28 = scalar_lea.hbm %s1070_s1, 4096 }
  0x38   : > { %p675_p12 = pneg %p1088_p10  ;;  %p679_p2 = scmp.lt.u32.totalorder %s938_s10, %s1070_s1 }
  0x39   : > { %p680_p7 = scmp.lt.u32.totalorder %s678_s28, %s673_s18  ;;  %p682_p11 = scmp.lt.u32.totalorder %s673_s18, %s938_s10 }
  0x3a   : > { %p676_p0 = pnand %p675_p12, %p674_p8 }
  0x3b   : > { %p681_p9 = por %p680_p7, %p679_p2 }
  0x3c   : > { %p677_p5 = pneg %p676_p0 }
  0x3d   : > { %p683_p13 = por %p682_p11, %p681_p9 }
  0x3f   : > { %p684_p4 = pnand %p683_p13, %p677_p5 }
  0x41   : > { %687 = shalt.err (!%p684_p4)
}
  0x42   : > { %s688_s4 = scalar_lea.vmem %s943_s11, 2048  ;;  %s794_s5 = smov [#allocation5]  }
  0x43   : > { %p689_p1 = scmp.ne.s32.totalorder %s943_s11, %s688_s4  ;;  %s693_s27 = sshll.u32 %s794_s5, 4  ;;  %s694_s27 = int_to_ptr.vmem [resolvable:$false] %s693_s27 }
  0x44   : > { %s695_s7 = scalar_lea.vmem %s694_s27, 4096  ;;  %p696_p8 = scmp.lt.s32.totalorder %s943_s11, %s694_s27 }
  0x45   : > { %p691_p3 = pnand %p689_p1, %p675_p12  ;;  %p697_p0 = scmp.lt.s32.totalorder %s695_s7, %s688_s4 }
  0x47   : > { %p692_p6 = pneg %p691_p3  ;;  %p698_p2 = por %p697_p0, %p696_p8 }
  0x49   : > { %p699_p7 = pnand %p698_p2, %p692_p6 }
  0x4b   : > { %702 = shalt.err (!%p699_p7)
}
  0x4c   : > { %s795_s18 = smov 256   ;;  %s1089_s8 = smov 128  }
  0x4d   : > { %581 = dma.hbm_to_vmem [thread:$0]  (!%p1088_p10), %s938_s10, 2048, %s943_s11, %s945_s26, %s795_s18, %s1089_s8, %s793_s19  }
  0x4e   : > { %p1090_p12 = scmp.ne.s32.totalorder %s1085_s25, 0 }
  0x4f   : > { %p1091_p5 = scmp.ne.s32.totalorder (!%p1090_p12), %s1080_s20, 0 }
  0x50   : > { %200 = sbr.rel (%p1090_p12) target bundleno = 358 (0x166), region = 32 }
  0x57   : > { %756 = dma.done.wait (%p1091_p5), [#allocation3], 256  }
  0x58   : > { %758 = vsyncadd (%p1091_p5), [#allocation3], 4294967040  ;;  %s982_s28 = sand.u32 1, %s773_s13   ;;  %p1092_p10 = scmp.ne.s32.totalorder %s1082_s22, 0 }
  0x59   : > { %s474_s29 = sshll.u32 %s982_s28, 7  ;;  %s207_s6 = scalar_lea.sflag [#allocation6], %s982_s28 }
  0x5a   : > { %s986_s9 = scalar_lea.vmem [#allocation5], %s474_s29 }
  0x5b   : > { %760 = dma.done.wait (%p1092_p10), %s207_s6, 2048  }
  0x5c   : > { %762 = vsyncadd (%p1092_p10), %s207_s6, 4294965248  ;;  %v243_v0 = vld [vmem:[%s986_s9] sm:$0xff]  ;;  %v244_v1 = vld [vmem:[%s986_s9 + $0x8] sm:$0xff]  ;;  %p237_p9 = scmp.lt.s32.totalorder %s781_s15, 1  ;;  %s475_s20 = sshll.u32 %s982_s28, 4 }
  0x5d   : > { %v245_v2 = vld [vmem:[%s986_s9 + $0x10] sm:$0xff]  ;;  %v534_v3 = vpack.c.bf16 %v244_v1, %v243_v0  ;;  %v246_v4 = vld [vmem:[%s986_s9 + $0x18] sm:$0xff]  ;;  %v247_v6 = vld [vmem:[%s986_s9 + $0x20] sm:$0xff]  ;;  %s235_s11 = scalar_lea.vmem [#allocation7], %s475_s20  ;;  %s478_s4 = sshll.u32 %s781_s15, 7 }
  0x5e   : > { %v538_v5 = vpack.c.bf16 %v246_v4, %v245_v2  ;;  %v248_v7 = vld [vmem:[%s986_s9 + $0x28] sm:$0xff]  ;;  %v241_v9 = vld [vmem:[#allocation2] sm:$0xff]  ;;  %v250_v11 = vld [vmem:[%s986_s9 + $0x38] sm:$0xff]  ;;  %s238_s22 = scalar_select %p237_p9, %s781_s15, 1 }
  0x5f   : > { %535 = vmatprep.subr.bf16.mxu0 %v534_v3  ;;  %v542_v8 = vpack.c.bf16 %v248_v7, %v247_v6  ;;  %v249_v10 = vld [vmem:[%s986_s9 + $0x30] sm:$0xff]  ;;  %531 = vmatprep.mubr.f32.mxu0 %v241_v9  ;;  %v251_v13 = vld [vmem:[%s986_s9 + $0x40] sm:$0xff]  ;;  %v252_v14 = vld [vmem:[%s986_s9 + $0x48] sm:$0xff]  ;;  %s359_s26 = sshll.u32 %s235_s11, 4  ;;  %s1020_s7 = scalar_lea.hbm %s1072_s3, %s478_s4  ;;  %s1015_s26 = int_to_ptr.vmem [resolvable:$true] %s359_s26 }
  0x60   : > { %537 = vmatpush3.bf16.msra.mxu0 %v534_v3  ;;  %v546_v12 = vpack.c.bf16 %v250_v11, %v249_v10  ;;  %v550_v15 = vpack.c.bf16 %v252_v14, %v251_v13  ;;  %v253_v16 = vld [vmem:[%s986_s9 + $0x50] sm:$0xff]  ;;  %v254_v17 = vld [vmem:[%s986_s9 + $0x58] sm:$0xff]  ;;  %v255_v19 = vld [vmem:[%s986_s9 + $0x60] sm:$0xff]  ;;  %s239_s10 = scalar_lea.vmem %s1071_s2, %s238_s22  ;;  %s344_s18 = scalar_lea.sflag [#allocation4], %s982_s28 }
  0x61   : > { %539 = vmatprep.subr.bf16.mxu0 %v538_v5  ;;  %v554_v18 = vpack.c.bf16 %v254_v17, %v253_v16  ;;  %v256_v20 = vld [vmem:[%s986_s9 + $0x68] sm:$0xff]  ;;  %v257_v22 = vld [vmem:[%s986_s9 + $0x70] sm:$0xff]  ;;  %v258_v23 = vld [vmem:[%s986_s9 + $0x78] sm:$0xff]  ;;  %s703_s8 = scalar_lea.vmem %s1015_s26, 256  ;;  %p1093_p13 = scmp.ne.s32.totalorder %s1083_s23, 0 }
  0x62   : > { %v558_v21 = vpack.c.bf16 %v256_v20, %v255_v19  ;;  %v562_v24 = vpack.c.bf16 %v258_v23, %v257_v22  ;;  %v242_v25 = vld [vmem:[#allocation2 + $0x8] sm:$0xff]  ;;  %v476_v26 = vld [vmem:[%s239_s10] ss:$0 sm:$0xff]  ;;  %p704_p11 = scmp.ne.s32.totalorder %s1015_s26, %s703_s8  ;;  %s796_s15 = smov [#allocation7]  }
  0x63   : > { %s707_s29 = sshll.u32 %s796_s15, 4  ;;  %s708_s29 = int_to_ptr.vmem [resolvable:$false] %s707_s29 }
  0x64   : > { %541 = vmatpush3.bf16.msra.mxu0 %v538_v5  ;;  %p705_p4 = pnand %p704_p11, %p1093_p13  ;;  %s709_s6 = scalar_lea.vmem %s708_s29, 512 }
  0x65   : > { %543 = vmatprep.subr.bf16.mxu0 %v542_v8  ;;  %p710_p3 = scmp.lt.s32.totalorder %s1015_s26, %s708_s29  ;;  %p711_p6 = scmp.lt.s32.totalorder %s709_s6, %s703_s8 }
  0x66   : > { %p706_p1 = pneg %p705_p4 }
  0x67   : > { %p712_p8 = por %p711_p6, %p710_p3 }
  0x68   : > { %545 = vmatpush3.bf16.msra.mxu0 %v542_v8 }
  0x69   : > { %547 = vmatprep.subr.bf16.mxu0 %v546_v12  ;;  %p713_p0 = pnand %p712_p8, %p706_p1 }
  0x6c   : > { %549 = vmatpush3.bf16.msra.mxu0 %v546_v12 }
  0x6d   : > { %551 = vmatprep.subr.bf16.mxu0 %v550_v15 }
  0x70   : > { %553 = vmatpush3.bf16.msra.mxu0 %v550_v15 }
  0x71   : > { %555 = vmatprep.subr.bf16.mxu0 %v554_v18 }
  0x74   : > { %557 = vmatpush3.bf16.msra.mxu0 %v554_v18 }
  0x75   : > { %559 = vmatprep.subr.bf16.mxu0 %v558_v21 }
  0x78   : > { %561 = vmatpush3.bf16.msra.mxu0 %v558_v21 }
  0x79   : > { %563 = vmatprep.subr.bf16.mxu0 %v562_v24 }
  0x7c   : > { %565 = vmatpush3.bf16.msra.mxu0 %v562_v24 }
  0x7f   : > { %532 = vmatmul.mubr.f32.vlgmr.msra.gmra.mrb[0].mxu0 %v242_v25 }
 0x152   : > { %v533_v27 = vpop.f32.mrb[0].mxu0 }
 0x153   : > { %v338_v28 = vadd.f32 %v533_v27, %v476_v26  ;;  %v332_v29 = vpop.f32.mrb[1].mxu0 }
 0x154   : > { %v333_v30 = vadd.f32 %v476_v26, %v332_v29 }
 0x155   : > { %342 = vst [vmem:[%s235_s11 + $0x8] sm:$0xff] %v338_v28 }
 0x156   : > { %341 = vst [vmem:[%s235_s11] sm:$0xff] %v333_v30 }
 0x157   : > { %716 = shalt.err (!%p713_p0)
}
 0x158   : > { %s717_s9 = scalar_lea.hbm %s1020_s7, 256  ;;  %s721_s25 = scalar_lea.hbm %s1072_s3, 512 }
 0x159   : > { %p718_p2 = scmp.ne.s32.totalorder %s1020_s7, %s717_s9  ;;  %p722_p5 = scmp.lt.u32.totalorder %s1020_s7, %s1072_s3 }
 0x15a   : > { %p723_p10 = scmp.lt.u32.totalorder %s721_s25, %s717_s9  ;;  %p725_p11 = scmp.lt.u32.totalorder %s717_s9, %s1020_s7 }
 0x15b   : > { %p719_p7 = pnand %p718_p2, %p1093_p13 }
 0x15c   : > { %p724_p9 = por %p723_p10, %p722_p5 }
 0x15d   : > { %p720_p12 = pneg %p719_p7 }
 0x15e   : > { %p726_p4 = por %p725_p11, %p724_p9 }
 0x160   : > { %p727_p1 = pnand %p726_p4, %p720_p12 }
 0x162   : > { %730 = shalt.err (!%p727_p1)
}
 0x163   : > { %s797_s11 = smov 128   ;;  %s798_s4 = smov 256  }
 0x164   : > { %s799_s5 = smov 8  }
 0x165   : > { %572 = dma.vmem_to_hbm [thread:$0]  (%p1093_p13), %s1015_s26, 256, %s1020_s7, %s344_s18, %s797_s11, %s798_s4, %s799_s5  }
 0x166 PF: > { %s374_s27 = sand.u32 1, %s769_s12   ;;  %p1094_p3 = scmp.ne.s32.totalorder %s1084_s24, 0 }
 0x167   : > { %p1095_p6 = scmp.ge.s32.totalorder %s789_s17, 2  ;;  %s375_s8 = scalar_lea.sflag [#allocation4], %s374_s27 }
 0x169   : > { %p583_p8 = pnand %p1095_p6, %p1094_p3 }
 0x16b   : > { %764 = dma.done.wait (!%p583_p8), %s375_s8, 256  }
 0x16c   : > { %766 = vsyncadd (!%p583_p8), %s375_s8, 4294967040  ;;  %s20_s17 = sadd.s32 1, %s789_s17   ;;  %s1096_s12 = smov %s773_s13 }
 0x16d   : > { %p17_p0 = scmp.ge.s32.totalorder %s20_s17, 4   ;;  %s1097_s13 = smov %s777_s14 }
 0x16e   : > { %s1098_s14 = smov %s941_s21  ;;  %s1099_s15 = smov %s785_s16 }
 0x16f   : > { %s1100_s16 = smov %s1102_s30  ;;  %19 = sbr.rel (!%p17_p0) target bundleno = 7 (0x7), region = 86 }
 0x176   :  { %380 = vsyncpa [#allocation3], 1 }
 0x177   :  { %382 = vsyncpa [#allocation3 + $0x1], 1 }
 0x178   :  { %383 = vsyncpa [#allocation6], 1 }
 0x179   :  { %385 = vsyncpa [#allocation6 + $0x1], 1 }
 0x17a   :  { %386 = vsyncpa [#allocation4], 1 }
 0x17b   :  { %388 = vsyncpa [#allocation4 + $0x1], 1 }

</bundles_post_ra>
